<compile_context>
chip_gen: v7x
topology: tpu7x:2x2x1
jax: 0.10.0
libtpu: 0.0.40
codegen_flags: <defaults>
</compile_context>

<pallas_src>
import functools

import jax
import jax.numpy as jnp
from jax.experimental import pallas as pl
from jax.experimental.pallas import tpu as pltpu


# -------------------- fused Pallas kernel (conv∘deconv GEMM -> mask epilogue) --------------------

def _fused_gemm_mask_kernel(a_ref, m_ref, w_ref, r_ref, o_ref):
    """All operands transposed: M (= B*Ho*Wo) is the lane (last) axis.

    a_ref : (KKC, bm)  f32  im2col patches^T
    m_ref : (KK,  bm)  f32  active-site mask^T (UNbroadcast over channels)
    w_ref : (KKC, KKC) f32  fused effective weight W_eff = Wd^T @ Wc^T
    r_ref : (KKC, KK)  f32  0/1 channel-replication matrix (broadcast mask over Cin via MXU)
    o_ref : (KKC, bm)  f32  masked deconv columns^T
    """
    # conv + deconv fused into one GEMM: y^T = W_eff @ patches^T   -> (KKC, bm)
    y = jnp.dot(w_ref[...], a_ref[...], preferred_element_type=jnp.float32)
    # Broadcast the (KK, bm) mask over Cin rows with a tiny 0/1 matmul (exact, avoids any
    # in-kernel sublane reshape/relayout); then mask as a VPU epilogue, lane-dense store.
    mask = jnp.dot(r_ref[...], m_ref[...], preferred_element_type=jnp.float32)
    o_ref[...] = y * mask


def _pick_bm(M):
    """Lane-block size along M. Full-array block when M isn't a multiple of 128
    (block dim == array dim -> exempt from the (8,128) rule, no padding copy)."""
    if M % 128 != 0:
        # TODO(synk): for very large non-128-multiple M this single full block could exceed
        # the scoped VMEM limit; pad M in the wrapper in that case.
        return M
    bm = 128
    # Grow the tile: with KKC = 16 even bm = 8192 is only ~2.5 MiB across all streams
    # (double-buffered), far below scoped VMEM on v5e/v6e/v7x. Fewer, bigger steps amortize
    # the ~0.35 us per-grid-step overhead.
    while bm * 2 <= 8192 and M % (bm * 2) == 0:
        bm *= 2
    return bm


def fused_conv_deconv_mask(patches_t, mask_t, w_eff, rep):
    """patches_t: [KKC, M] f32; mask_t: [KK, M] f32; w_eff: [KKC, KKC] f32;
    rep: [KKC, KK] f32 0/1  ->  [KKC, M] f32 (masked deconv output, transposed)."""
    KKC, M = patches_t.shape
    KK = mask_t.shape[0]
    bm = _pick_bm(M)
    grid = (M // bm,)

    return pl.pallas_call(
        _fused_gemm_mask_kernel,
        out_shape=jax.ShapeDtypeStruct((KKC, M), jnp.float32),
        grid=grid,
        in_specs=[
            pl.BlockSpec((KKC, bm), lambda i: (0, i)),    # patches^T (lane-blocked along M)
            pl.BlockSpec((KK, bm), lambda i: (0, i)),     # unbroadcast mask^T
            pl.BlockSpec((KKC, KKC), lambda i: (0, 0)),   # fused weight (full, replicated)
            pl.BlockSpec((KKC, KK), lambda i: (0, 0)),    # replication matrix (full, replicated)
        ],
        out_specs=pl.BlockSpec((KKC, bm), lambda i: (0, i)),
        compiler_params=pltpu.CompilerParams(dimension_semantics=("parallel",)),
    )(patches_t, mask_t, w_eff, rep)


# --------------------------------------- forward pass ---------------------------------------

@functools.partial(jax.jit, static_argnums=(2, 3, 6, 7))
def scn_couple_deconv_forward(features, coors, batch_size, spatial_shape,
                              w_conv, w_deconv, kernel_size, stride):
    """features: [N, Cin] f32; coors: [N, 3] int32 as (y, x, batch_idx) (SCN convention:
    batch index in the last column). Returns dense NCHW [B, Cin, H, W] float32."""
    H, W = spatial_shape
    k, s = kernel_size, stride
    # TODO(synk): general k != stride path (overlapping windows -> true col2im scatter-add)
    # not implemented; the reference test config uses kernel_size == stride.
    assert k == s, "fast path assumes kernel_size == stride (disjoint windows)"
    Cin = features.shape[1]
    Cout = w_conv.shape[2]
    Ho = (H - k) // s + 1
    Wo = (W - k) // s + 1
    KK = k * k
    KKC = KK * Cin
    M = batch_size * Ho * Wo

    yy = coors[:, 0]
    xx = coors[:, 1]
    bb = coors[:, 2]

    # scn.InputLayer(mode=0): densify sparse features (XLA scatter).
    # TODO(synk): duplicate-coordinate handling of InputLayer mode=0 not reproduced;
    # coordinates are assumed unique (as generated below).
    dense = jnp.zeros((batch_size, H, W, Cin), jnp.float32).at[bb, yy, xx, :].set(features)
    mask = jnp.zeros((batch_size, H, W), jnp.float32).at[bb, yy, xx].set(1.0)

    # im2col as pure space-to-depth (k == stride -> disjoint windows), transposed so that
    # M = B*Ho*Wo lands on the lane axis:  patches_t[(ki*k+kj)*Cin+c, b*Ho*Wo+ho*Wo+wo]
    #   = dense[b, ho*k+ki, wo*k+kj, c]
    patches_t = jnp.transpose(
        dense.reshape(batch_size, Ho, k, Wo, k, Cin), (2, 4, 5, 0, 1, 3)
    ).reshape(KKC, M)

    # Active-site mask in the same transposed layout, UNbroadcast over channels:
    # mask_t[ki*k+kj, b*Ho*Wo+ho*Wo+wo] = mask[b, ho*k+ki, wo*k+kj]
    mask_t = jnp.transpose(
        mask.reshape(batch_size, Ho, k, Wo, k), (2, 4, 0, 1, 3)
    ).reshape(KK, M)

    # SCN weight shapes: w_conv [k^2, Cin, Cout], w_deconv [k^2, Cout, Cin].
    # Conv GEMM would be  h^T = Wc^T @ patches^T with Wc^T: (Cout, KKC);
    # deconv GEMM would be y^T = Wd^T @ h^T     with Wd^T: (KKC, Cout).
    # No bias / nonlinearity between them -> fuse exactly: W_eff = Wd^T @ Wc^T (f32).
    wc_t = w_conv.reshape(KKC, Cout).T                                   # (Cout, KKC)
    wd_t = jnp.transpose(w_deconv, (0, 2, 1)).reshape(KKC, Cout)         # (KKC, Cout)
    w_eff = jnp.dot(wd_t, wc_t, preferred_element_type=jnp.float32)      # (KKC, KKC)

    # 0/1 replication matrix: row (f*Cin + c) has a 1 in column f -> broadcasts the
    # per-offset mask over channels inside the kernel via a tiny MXU matmul.
    rep = jnp.repeat(jnp.eye(KK, dtype=jnp.float32), Cin, axis=0)        # (KKC, KK)

    # Fused: (conv∘deconv) GEMM -> channel-broadcast mask epilogue, one Pallas launch.
    out_t = fused_conv_deconv_mask(patches_t, mask_t, w_eff, rep)        # (KKC, M) f32

    # Depth-to-space (col2im with disjoint windows) straight into NCHW:
    # out[b, c, ho*k+ki, wo*k+kj] = out_t[(ki*k+kj)*Cin+c, b*Ho*Wo+ho*Wo+wo]
    out_nchw = jnp.transpose(
        out_t.reshape(k, k, Cin, batch_size, Ho, Wo), (3, 2, 4, 0, 5, 1)
    ).reshape(batch_size, Cin, H, W)
    return out_nchw


# ------------------------------------------- main -------------------------------------------

if __name__ == "__main__":
    # Module config (num_layers is unused by the reference forward pass).
    ndim = 2
    shape = (16, 16)
    in_channels = 4
    out_channels = 8
    kernel_size = 2
    stride = 2
    batch_size = 2
    n_per_batch = 20

    H, W = shape
    key = jax.random.PRNGKey(0)
    k_coord, k_feat, k_wc, k_wd = jax.random.split(key, 4)

    # Deterministic, unique sparse coordinates per batch: (y, x, batch_idx).
    coord_chunks = []
    for bi in range(batch_size):
        flat = jax.random.permutation(jax.random.fold_in(k_coord, bi), H * W)[:n_per_batch]
        yy = (flat // W).astype(jnp.int32)
        xx = (flat % W).astype(jnp.int32)
        bb = jnp.full((n_per_batch,), bi, jnp.int32)
        coord_chunks.append(jnp.stack([yy, xx, bb], axis=1))
    coors = jnp.concatenate(coord_chunks, axis=0)                       # [N, 3]
    N = coors.shape[0]

    features = jax.random.normal(k_feat, (N, in_channels), jnp.float32)

    # Deterministic parameter init (SCN weight shapes: [k^ndim, Cin, Cout] / [k^ndim, Cout, Cin]).
    w_conv = 0.1 * jax.random.normal(k_wc, (kernel_size * kernel_size, in_channels, out_channels),
                                     jnp.float32)
    w_deconv = 0.1 * jax.random.normal(k_wd, (kernel_size * kernel_size, out_channels, in_channels),
                                       jnp.float32)

    out = scn_couple_deconv_forward(features, coors, batch_size, shape,
                                    w_conv, w_deconv, kernel_size, stride)
    out = jax.block_until_ready(out)
    assert out.shape == (batch_size, in_channels, H, W), out.shape
    assert out.dtype == jnp.float32
    print("KERNEL_OK")
</pallas_src>

<mosaic_0001>
module attributes {stable_mosaic.version = 11 : i64} {
  func.func @_fused_gemm_mask_kernel(%arg0: i32, %arg1: memref<16x128xf32, #tpu.memory_space<vmem>>, %arg2: memref<4x128xf32, #tpu.memory_space<vmem>>, %arg3: memref<16x16xf32, #tpu.memory_space<vmem>>, %arg4: memref<16x4xf32, #tpu.memory_space<vmem>>, %arg5: memref<16x128xf32, #tpu.memory_space<vmem>>) attributes {dimension_semantics = [#tpu.dimension_semantics<parallel>], iteration_bounds = array<i64: 1>, scalar_prefetch = 0 : i64, scratch_operands = 0 : i64, tpu.core_type = #tpu.core_type<tc>, window_params = [{transform_indices = @transform_0, window_bounds = array<i64: 16, 128>}, {transform_indices = @transform_1, window_bounds = array<i64: 4, 128>}, {pipeline_mode = #tpu.pipeline_mode<synchronous>, transform_indices = @transform_2, window_bounds = array<i64: 16, 16>}, {pipeline_mode = #tpu.pipeline_mode<synchronous>, transform_indices = @transform_3, window_bounds = array<i64: 16, 4>}, {transform_indices = @transform_4, window_bounds = array<i64: 16, 128>}]} {
    %c0 = arith.constant 0 : index
    %c0_0 = arith.constant 0 : index
    %0 = vector.load %arg3[%c0, %c0_0] : memref<16x16xf32, #tpu.memory_space<vmem>>, vector<16x16xf32>
    %c0_1 = arith.constant 0 : index
    %c0_2 = arith.constant 0 : index
    %1 = vector.load %arg1[%c0_1, %c0_2] : memref<16x128xf32, #tpu.memory_space<vmem>>, vector<16x128xf32>
    %cst = arith.constant dense<0.000000e+00> : vector<16x128xf32>
    %2 = tpu.matmul %0, %1, %cst {dimension_numbers = #tpu.dot_dimension_numbers<[1], [0], [0], [1], [0, 0, 1, 1], [], []>} : vector<16x16xf32>, vector<16x128xf32>, vector<16x128xf32> -> vector<16x128xf32>
    %c0_3 = arith.constant 0 : index
    %c0_4 = arith.constant 0 : index
    %3 = vector.load %arg4[%c0_3, %c0_4] : memref<16x4xf32, #tpu.memory_space<vmem>>, vector<16x4xf32>
    %c0_5 = arith.constant 0 : index
    %c0_6 = arith.constant 0 : index
    %4 = vector.load %arg2[%c0_5, %c0_6] : memref<4x128xf32, #tpu.memory_space<vmem>>, vector<4x128xf32>
    %cst_7 = arith.constant dense<0.000000e+00> : vector<16x128xf32>
    %5 = tpu.matmul %3, %4, %cst_7 {dimension_numbers = #tpu.dot_dimension_numbers<[1], [0], [0], [1], [0, 0, 1, 1], [], []>} : vector<16x4xf32>, vector<4x128xf32>, vector<16x128xf32> -> vector<16x128xf32>
    %6 = arith.mulf %2, %5 : vector<16x128xf32>
    %c0_8 = arith.constant 0 : index
    %c0_9 = arith.constant 0 : index
    %7 = vector.load %arg5[%c0_8, %c0_9] : memref<16x128xf32, #tpu.memory_space<vmem>>, vector<16x128xf32>
    tpu.vector_store %arg5[%c0_8, %c0_9], %6 {strides = array<i32>} : memref<16x128xf32, #tpu.memory_space<vmem>>, vector<16x128xf32>,
    return
  }
  func.func @transform_0(%arg0: i32) -> (i32, i32) {
    %c0_i32 = arith.constant 0 : i32
    %c0_i32_0 = arith.constant 0 : i32
    return %c0_i32, %arg0 : i32, i32
  }
  func.func @transform_1(%arg0: i32) -> (i32, i32) {
    %c0_i32 = arith.constant 0 : i32
    %c0_i32_0 = arith.constant 0 : i32
    return %c0_i32, %arg0 : i32, i32
  }
  func.func @transform_2(%arg0: i32) -> (i32, i32) {
    %c0_i32 = arith.constant 0 : i32
    %c0_i32_0 = arith.constant 0 : i32
    %c0_i32_1 = arith.constant 0 : i32
    return %c0_i32, %c0_i32_0 : i32, i32
  }
  func.func @transform_3(%arg0: i32) -> (i32, i32) {
    %c0_i32 = arith.constant 0 : i32
    %c0_i32_0 = arith.constant 0 : i32
    %c0_i32_1 = arith.constant 0 : i32
    return %c0_i32, %c0_i32_0 : i32, i32
  }
  func.func @transform_4(%arg0: i32) -> (i32, i32) {
    %c0_i32 = arith.constant 0 : i32
    %c0_i32_0 = arith.constant 0 : i32
    return %c0_i32, %arg0 : i32, i32
  }
}

</mosaic_0001>

<bundles_post_ra>
// kernel: scn_couple_deconv_forward.1
= control target key start
LH: loop header
LB: loop body
LE: loop exit
PB: predicated region body
PF: predicated region fallthrough
CT: control target
= control target key end

     0   :  { %vm113_vm0 = vcmask 1043456   ;;  %vm106_vm1 = vcmask 31744   ;;  %vm21_vm2 = vcmask 130048   ;;  %s282_s0 = inlined_call_operand.vmem [shape: f32[16,128], index: 0, kind: input, shape index: {}]   ;;  %s283_s1 = inlined_call_operand.vmem [shape: f32[4,128], index: 1, kind: input, shape index: {}]   ;;  %s284_s3 = inlined_call_operand.vmem [shape: f32[16,4], index: 3, kind: input, shape index: {}]   ;;  %s285_s2 = inlined_call_operand.vmem [shape: f32[16,16], index: 2, kind: input, shape index: {}]   ;;  %s286_s4 = inlined_call_operand.vmem [shape: f32[16,128], index: 4, kind: output, shape index: {}]  }
   0x1   :  { %v19_v0 = vld [vmem:[%s282_s0] sm:$0xff]  ;;  %v20_v1 = vld [vmem:[%s282_s0 + $0x8] sm:$0xff] }
   0x2   :  { %v105_v2 = vld [vmem:[%s283_s1] sm:$0xf]  ;;  %v224_v3 = vpack.c.bf16 %v20_v1, %v19_v0  ;;  %v104_v5 = vld [vmem:[%s284_s3 + $0x8] sm:$0xff] }
   0x3   :  { %219 = vmatprep.subr.msk.mxu1 %vm113_vm0, %v105_v2  ;;  %v103_v4 = vld [vmem:[%s284_s3] sm:$0xff]  ;;  %v18_v7 = vld [vmem:[%s285_s2 + $0x8] sm:$0xff] }
   0x4   :  { %v17_v6 = vld [vmem:[%s285_s2] sm:$0xff]  ;;  %220 = vmatpush3.msk.msra.mxu1 %vm113_vm0, %v105_v2  ;;  %221 = vmatprep.mubr.msk.f32.mxu1 %vm106_vm1, %v103_v4 }
   0x5   :  { %225 = vmatprep.subr.bf16.mxu0 %v224_v3  ;;  %216 = vmatprep.mubr.msk.f32.mxu0 %vm21_vm2, %v17_v6 }
   0x6   :  { %227 = vmatpush3.bf16.msra.mxu0 %v224_v3  ;;  %222 = vmatmul.mubr.msk.f32.vlgmr.msra.gmra.mrb[0].mxu1 %vm106_vm1, %v104_v5 }
   0x9   :  { %217 = vmatmul.mubr.msk.f32.vlgmr.msra.gmra.mrb[0].mxu0 %vm21_vm2, %v18_v7 }
  0xd9   :  { %v223_v8 = vpop.f32.mrb[0].mxu1 }
  0xda   :  { %v183_v9 = vpop.f32.mrb[1].mxu1 }
  0xdc   :  { %v218_v10 = vpop.f32.mrb[0].mxu0 }
  0xdd   :  { %v193_v11 = vmul.f32 %v223_v8, %v218_v10  ;;  %v94_v12 = vpop.f32.mrb[1].mxu0 }
  0xde   :  { %v192_v13 = vmul.f32 %v183_v9, %v94_v12 }
  0xdf   :  { %195 = vst [vmem:[%s286_s4 + $0x8] sm:$0xff] %v193_v11 }
  0xe0   :  { %194 = vst [vmem:[%s286_s4] sm:$0xff] %v192_v13 }

</bundles_post_ra>
